<compile_context>
chip_gen: v6e
topology: v6e:2x2x1
jax: 0.10.0
libtpu: 0.0.40
codegen_flags: <defaults>
</compile_context>

<pallas_src>
import functools
import math

import jax
import jax.numpy as jnp
from jax import lax
from jax.experimental import pallas as pl
from jax.experimental.pallas import tpu as pltpu

_MIB = 1024 * 1024
_WRES_BUDGET = 36 * _MIB    # max estimated live VMEM for the weight-resident linear
_VMEM_CAP = 48 * _MIB       # never request more scoped VMEM than this (v7x: 64 MiB physical)
_VMEM_FLOOR = 32 * _MIB     # raise v5e's 16 MiB scoped default
_SCORE_BUDGET = 24 * _MIB   # budget for the f32 (Gh,S,S) score/exp working set


def _vmem_limit(estimate_bytes):
    return int(min(_VMEM_CAP, max(_VMEM_FLOOR, int(estimate_bytes * 1.25))))


def _pick_tile(dim, target, align):
    """Largest `align`-multiple divisor of `dim` that is <= target, else None."""
    start = (min(dim, target) // align) * align
    for t in range(start, 0, -align):
        if dim % t == 0:
            return t
    return None


def _row_tile(M, target, align):
    """Pick an M row-tile.  Returns (tm, M_padded); pads instead of silently using full M."""
    if M <= target:
        return M, M
    t = _pick_tile(M, target, align)
    if t is not None:
        return t, M
    tm = max(align, (target // align) * align)
    Mp = ((M + tm - 1) // tm) * tm
    return tm, Mp


def _largest_divisor_leq(n, cap):
    for t in range(min(n, cap), 0, -1):
        if n % t == 0:
            return t
    return 1


# ----------------------------------------------------------------------------
# Kernel 1a: weight-resident dense linear  y = x @ W + b
#   grid = (M/tm,);  full (K, N) weight block (constant index -> VMEM resident)
# ----------------------------------------------------------------------------
def _linear_wres_kernel(x_ref, w_ref, b_ref, o_ref):
    acc = jnp.dot(x_ref[...], w_ref[...], preferred_element_type=jnp.float32)
    o_ref[...] = (acc + b_ref[...].astype(jnp.float32)).astype(o_ref.dtype)


# ----------------------------------------------------------------------------
# Kernel 1b: tiled fallback linear (only for weights too big to stay resident)
# ----------------------------------------------------------------------------
def _linear_tiled_kernel(x_ref, w_ref, b_ref, o_ref, acc_ref):
    @pl.when(pl.program_id(2) == 0)
    def _init():
        acc_ref[...] = jnp.zeros_like(acc_ref)

    acc_ref[...] += jnp.dot(x_ref[...], w_ref[...], preferred_element_type=jnp.float32)

    @pl.when(pl.program_id(2) == pl.num_programs(2) - 1)
    def _finalize():
        o_ref[...] = (acc_ref[...] + b_ref[...].astype(jnp.float32)).astype(o_ref.dtype)


def pallas_linear(x2d, w, b, *, out_dtype=None, tm_target=256):
    """y = x2d @ w + b.  `w` should already be in x2d's dtype (pre-cast), `b` may stay f32."""
    M, K = x2d.shape
    K2, N = w.shape
    assert K == K2
    out_dtype = x2d.dtype if out_dtype is None else out_dtype
    w = w.astype(x2d.dtype)          # no-op when pre-cast in __init__
    b2d = b.reshape(1, N)            # bias kept in its own (f32) dtype

    in_b = jnp.dtype(x2d.dtype).itemsize
    out_b = jnp.dtype(out_dtype).itemsize
    align = 16 if in_b <= 2 else 8
    tm, Mp = _row_tile(M, tm_target, align)
    if Mp != M:
        x2d = jnp.pad(x2d, ((0, Mp - M), (0, 0)))

    cost = pl.CostEstimate(flops=2 * M * N * K, transcendentals=0,
                           bytes_accessed=(M * K + K * N + N) * in_b + M * N * out_b)

    est = 2 * (tm * K + K * N + N) * in_b + 2 * tm * N * out_b + tm * N * 4
    if est <= _WRES_BUDGET:
        out = pl.pallas_call(
            _linear_wres_kernel,
            out_shape=jax.ShapeDtypeStruct((Mp, N), out_dtype),
            grid=(Mp // tm,),
            in_specs=[pl.BlockSpec((tm, K), lambda i: (i, 0)),
                      pl.BlockSpec((K, N), lambda i: (0, 0)),    # resident weight
                      pl.BlockSpec((1, N), lambda i: (0, 0))],   # resident bias
            out_specs=pl.BlockSpec((tm, N), lambda i: (i, 0)),
            compiler_params=pltpu.CompilerParams(
                dimension_semantics=("parallel",),
                vmem_limit_bytes=_vmem_limit(est)),
            cost_estimate=cost,
        )(x2d, w, b2d)
    else:
        tn = _pick_tile(N, 512, 128) or N
        tk = _pick_tile(K, 512, 128) or K
        est_t = 2 * (tm * tk + tk * tn + tn) * in_b + 2 * tm * tn * out_b + tm * tn * 4
        out = pl.pallas_call(
            _linear_tiled_kernel,
            out_shape=jax.ShapeDtypeStruct((Mp, N), out_dtype),
            grid=(Mp // tm, N // tn, K // tk),
            in_specs=[pl.BlockSpec((tm, tk), lambda i, j, k: (i, k)),
                      pl.BlockSpec((tk, tn), lambda i, j, k: (k, j)),
                      pl.BlockSpec((1, tn), lambda i, j, k: (0, j))],
            out_specs=pl.BlockSpec((tm, tn), lambda i, j, k: (i, j)),
            scratch_shapes=[pltpu.VMEM((tm, tn), jnp.float32)],
            compiler_params=pltpu.CompilerParams(
                dimension_semantics=("parallel", "parallel", "arbitrary"),
                vmem_limit_bytes=_vmem_limit(est_t)),
            cost_estimate=cost,
        )(x2d, w, b2d)
    return out[:M] if Mp != M else out


# ----------------------------------------------------------------------------
# Kernel 2: fused self-attention QKV projection (weight-resident, 3 outputs)
#   x is read once; Wq/Wk/Wv all stay VMEM-resident; Q/K/V written directly
#   (no (M, 3E) buffer, no XLA column-slice copies afterwards).
# ----------------------------------------------------------------------------
def _qkv_wres_kernel(x_ref, wq_ref, wk_ref, wv_ref, bq_ref, bk_ref, bv_ref,
                     q_ref, k_ref, v_ref):
    x = x_ref[...]
    q_ref[...] = (jnp.dot(x, wq_ref[...], preferred_element_type=jnp.float32)
                  + bq_ref[...].astype(jnp.float32)).astype(q_ref.dtype)
    k_ref[...] = (jnp.dot(x, wk_ref[...], preferred_element_type=jnp.float32)
                  + bk_ref[...].astype(jnp.float32)).astype(k_ref.dtype)
    v_ref[...] = (jnp.dot(x, wv_ref[...], preferred_element_type=jnp.float32)
                  + bv_ref[...].astype(jnp.float32)).astype(v_ref.dtype)


def pallas_qkv_linear(x2d, wq, wk, wv, bq, bk, bv, *, out_dtype=None, tm_target=256):
    M, K = x2d.shape
    E = wq.shape[1]
    out_dtype = x2d.dtype if out_dtype is None else out_dtype
    in_b = jnp.dtype(x2d.dtype).itemsize
    out_b = jnp.dtype(out_dtype).itemsize
    align = 16 if in_b <= 2 else 8
    tm, Mp = _row_tile(M, tm_target, align)

    est = (2 * (tm * K + 3 * K * E + 3 * E) * in_b
           + 2 * 3 * tm * E * out_b + 3 * tm * E * 4)
    if est > _WRES_BUDGET:
        # Weights too large to keep all three resident: fall back to separate linears.
        return (pallas_linear(x2d, wq, bq, out_dtype=out_dtype, tm_target=tm_target),
                pallas_linear(x2d, wk, bk, out_dtype=out_dtype, tm_target=tm_target),
                pallas_linear(x2d, wv, bv, out_dtype=out_dtype, tm_target=tm_target))

    if Mp != M:
        x2d = jnp.pad(x2d, ((0, Mp - M), (0, 0)))
    wq, wk, wv = wq.astype(x2d.dtype), wk.astype(x2d.dtype), wv.astype(x2d.dtype)
    bq2, bk2, bv2 = bq.reshape(1, E), bk.reshape(1, E), bv.reshape(1, E)

    x_spec = pl.BlockSpec((tm, K), lambda i: (i, 0))
    w_spec = pl.BlockSpec((K, E), lambda i: (0, 0))   # constant index -> VMEM resident
    b_spec = pl.BlockSpec((1, E), lambda i: (0, 0))
    o_spec = pl.BlockSpec((tm, E), lambda i: (i, 0))
    o_struct = jax.ShapeDtypeStruct((Mp, E), out_dtype)

    cost = pl.CostEstimate(
        flops=2 * M * 3 * E * K, transcendentals=0,
        bytes_accessed=(M * K + 3 * K * E + 3 * E) * in_b + 3 * M * E * out_b)

    q, k, v = pl.pallas_call(
        _qkv_wres_kernel,
        out_shape=(o_struct, o_struct, o_struct),
        grid=(Mp // tm,),
        in_specs=[x_spec, w_spec, w_spec, w_spec, b_spec, b_spec, b_spec],
        out_specs=(o_spec, o_spec, o_spec),
        compiler_params=pltpu.CompilerParams(
            dimension_semantics=("parallel",),
            vmem_limit_bytes=_vmem_limit(est)),
        cost_estimate=cost,
    )(x2d, wq, wk, wv, bq2, bk2, bv2)
    if Mp != M:
        q, k, v = q[:M], k[:M], v[:M]
    return q, k, v


# ----------------------------------------------------------------------------
# Kernel 3: attention core, Gh heads x 1 batch element per grid step.
#   scores = (Q*scale) K^T; masked add(-1e30); softmax numerator; @V; normalize.
#   Arrays are laid out (H, B, S, D) (== the torch .view(H,B,S,D) reshape).
# ----------------------------------------------------------------------------
def _attention_kernel(q_ref, k_ref, v_ref, m_ref, o_ref, *, scale):
    q = q_ref[:, 0] * scale                          # scale folded into (Gh,S,D), not (Gh,S,S)
    k = k_ref[:, 0]
    v = v_ref[:, 0]
    # additive mask: 0 visible, -1e30 padded (finite => no inf-inf NaN; a fully padded
    # row yields a uniform average instead of the reference's NaN).
    neg = jnp.where(m_ref[0] != 0, -1e30, 0.0).astype(jnp.float32)       # (1, S)

    # Q K^T without materializing k.T: contract over D, batch over heads.
    s = lax.dot_general(q, k, (((2,), (2,)), ((0,), (0,))),
                        preferred_element_type=jnp.float32)              # (Gh, S, S)
    s = s + neg[None]

    s_max = jnp.max(s, axis=-1, keepdims=True)
    p = jnp.exp(s - s_max)                                               # f32 softmax numerator
    denom = jnp.sum(p, axis=-1, keepdims=True)                           # (Gh, S, 1) f32

    ctx = lax.dot_general(p.astype(v.dtype), v, (((2,), (1,)), ((0,), (0,))),
                          preferred_element_type=jnp.float32)            # (Gh, S, D) f32 accum
    approx = q_ref.dtype == jnp.bfloat16                                 # EUP rcp on bf16 path
    ctx = ctx * pl.reciprocal(denom, approx=approx)                      # normalize AFTER PV
    o_ref[...] = ctx[:, None].astype(o_ref.dtype)


def pallas_attention(q_hbsd, k_hbsd, v_hbsd, mask_b1s, scale, *, max_heads_per_step=8):
    H, B, S, D = q_hbsd.shape
    # Cap the head-group so the f32 (Gh,S,S) score working set stays inside VMEM (v7x: 64 MiB).
    gh_cap = max(1, _SCORE_BUDGET // (3 * S * S * 4))
    Gh = _largest_divisor_leq(H, min(max_heads_per_step, gh_cap))
    grid = (H // Gh, B)

    in_b = jnp.dtype(q_hbsd.dtype).itemsize
    est = (2 * (3 * Gh * S * D * in_b + S * 4)       # double-buffered q/k/v + mask blocks
           + 2 * Gh * S * D * in_b                   # output block
           + 3 * Gh * S * S * 4)                     # f32 scores / exp / temporaries
    cost = pl.CostEstimate(
        flops=2 * 2 * H * B * S * S * D,
        transcendentals=H * B * S * S,
        bytes_accessed=4 * H * B * S * D * in_b + B * S * 4,
    )

    qkv_spec = pl.BlockSpec((Gh, 1, S, D), lambda hg, b: (hg, b, 0, 0))
    kernel = functools.partial(_attention_kernel, scale=scale)
    return pl.pallas_call(
        kernel,
        out_shape=jax.ShapeDtypeStruct((H, B, S, D), q_hbsd.dtype),
        grid=grid,
        in_specs=[
            qkv_spec, qkv_spec, qkv_spec,
            pl.BlockSpec((1, 1, S), lambda hg, b: (b, 0, 0)),   # mask (B,1,S): no H replication
        ],
        out_specs=qkv_spec,
        compiler_params=pltpu.CompilerParams(
            dimension_semantics=("parallel", "parallel"),
            vmem_limit_bytes=_vmem_limit(est)),
        cost_estimate=cost,
    )(q_hbsd, k_hbsd, v_hbsd, mask_b1s)


# ----------------------------------------------------------------------------
# Module wrapper (parameter setup + reshape glue in plain JAX)
# ----------------------------------------------------------------------------
class MultiHeadAttentionPallas:
    def __init__(self, ebd_dim, num_head, key, compute_dtype=jnp.bfloat16):
        assert ebd_dim % num_head == 0, 'single-head embedding length should be an integer!'
        self.ebd_dim = ebd_dim
        self.num_head = num_head
        self.head_dim = ebd_dim // num_head
        self.compute_dtype = compute_dtype

        keys = jax.random.split(key, 8)
        bound = 1.0 / math.sqrt(ebd_dim)

        def w(k):  # stored (in, out) so kernels compute x @ W
            return jax.random.uniform(k, (ebd_dim, ebd_dim), jnp.float32, -bound, bound)

        def b(k):
            return jax.random.uniform(k, (ebd_dim,), jnp.float32, -bound, bound)

        # f32 master parameters (also used by the pure-JAX reference).
        self.wq, self.bq = w(keys[0]), b(keys[1])
        self.wk, self.bk = w(keys[2]), b(keys[3])
        self.wv, self.bv = w(keys[4]), b(keys[5])
        self.wo, self.bo = w(keys[6]), b(keys[7])

        # Compute-dtype weight copies, cast ONCE here (not per forward call).
        cd = compute_dtype
        self.wq_c, self.wk_c = self.wq.astype(cd), self.wk.astype(cd)
        self.wv_c, self.wo_c = self.wv.astype(cd), self.wo.astype(cd)
        # Biases stay f32 (tiny; added to the f32 accumulator in-kernel).
        self.bq_2d = self.bq.reshape(1, ebd_dim)
        self.bk_2d = self.bk.reshape(1, ebd_dim)
        self.bv_2d = self.bv.reshape(1, ebd_dim)
        self.bo_2d = self.bo.reshape(1, ebd_dim)

    def __call__(self, W_Q, W_K, W_V, padding_mask):
        B, S, E = W_Q.shape
        H, D = self.num_head, self.head_dim
        dt = self.compute_dtype

        mask_b1s = padding_mask.astype(jnp.int32).reshape(B, 1, S)

        if (W_Q is W_K) and (W_K is W_V):
            # Self-attention fast path: x read from HBM once, all three projection
            # weights VMEM-resident, Q/K/V written directly (no XLA slice copies).
            x2d = W_Q.reshape(B * S, E).astype(dt)
            Q, K, V = pallas_qkv_linear(x2d, self.wq_c, self.wk_c, self.wv_c,
                                        self.bq_2d, self.bk_2d, self.bv_2d)
        else:
            Q = pallas_linear(W_Q.reshape(B * S, E).astype(dt), self.wq_c, self.bq_2d)
            K = pallas_linear(W_K.reshape(B * S, E).astype(dt), self.wk_c, self.bk_2d)
            V = pallas_linear(W_V.reshape(B * S, E).astype(dt), self.wv_c, self.bv_2d)

        # Reproduce torch's .view(H, B, S, D) — a pure row-major reshape (NOT the
        # standard per-token head split); bug-for-bug with the reference module.
        Qh = Q.reshape(H, B, S, D)
        Kh = K.reshape(H, B, S, D)
        Vh = V.reshape(H, B, S, D)

        ctx = pallas_attention(Qh, Kh, Vh, mask_b1s, 1.0 / math.sqrt(D))    # (H,B,S,D)

        # torch: .view(B,S,H,D).view(B,S,E) on the contiguous buffer == plain reshape.
        Z = pallas_linear(ctx.reshape(B * S, E), self.wo_c, self.bo_2d,
                          out_dtype=jnp.float32)
        return Z.reshape(B, S, E)


# ----------------------------------------------------------------------------
# Pure-JAX reference mirroring the PyTorch forward exactly (for verification)
# ----------------------------------------------------------------------------
def reference_forward(mod, W_Q, W_K, W_V, padding_mask):
    B, S, E = W_Q.shape
    H, D = mod.num_head, mod.head_dim
    Q = (W_Q.reshape(B * S, E) @ mod.wq + mod.bq).reshape(H, B, S, D)
    K = (W_K.reshape(B * S, E) @ mod.wk + mod.bk).reshape(H, B, S, D)
    V = (W_V.reshape(B * S, E) @ mod.wv + mod.bv).reshape(H, B, S, D)
    aw = jnp.einsum("hbqd,hbkd->hbqk", Q, K) / math.sqrt(D)
    pm = padding_mask[None, :, None, :]                                     # (1,B,1,S)
    aw = jnp.where(pm, -jnp.inf, aw)
    aw = jax.nn.softmax(aw, axis=-1)
    ctx = jnp.einsum("hbqk,hbkd->hbqd", aw, V)                              # (H,B,S,D)
    Z = (ctx.reshape(B * S, E) @ mod.wo + mod.bo).reshape(B, S, E)
    return Z


if __name__ == "__main__":
    B, S, E, H = 2, 8, 32, 4

    key = jax.random.PRNGKey(0)
    k_mod, k_x, k_k, k_v = jax.random.split(key, 4)

    mod_bf16 = MultiHeadAttentionPallas(E, H, k_mod)                        # bf16 default
    mod_f32 = MultiHeadAttentionPallas(E, H, k_mod, compute_dtype=jnp.float32)

    x = jax.random.normal(k_x, (B, S, E), jnp.float32)
    # padding mask: True = padded key position (batch 1 has 3 padded tokens)
    padding_mask = jnp.zeros((B, S), dtype=bool).at[1, S - 3:].set(True)

    ref = reference_forward(mod_f32, x, x, x, padding_mask)

    # 1) self-attention (fused, weight-resident QKV), f32 compute — tight tolerance
    out_f32 = jax.block_until_ready(mod_f32(x, x, x, padding_mask))
    assert out_f32.shape == (B, S, E)
    assert jnp.allclose(out_f32, ref, atol=1e-4, rtol=1e-4), "fused f32 mismatch vs reference"

    # 2) distinct Q/K/V inputs (general path), f32 compute
    Wk = jax.random.normal(k_k, (B, S, E), jnp.float32)
    Wv = jax.random.normal(k_v, (B, S, E), jnp.float32)
    ref2 = reference_forward(mod_f32, x, Wk, Wv, padding_mask)
    out2 = jax.block_until_ready(mod_f32(x, Wk, Wv, padding_mask))
    assert jnp.allclose(out2, ref2, atol=1e-4, rtol=1e-4), "unfused f32 mismatch vs reference"

    # 3) default bf16 path (bf16 MXU operands, f32 accumulation/softmax) — loose tolerance
    out_bf = jax.block_until_ready(mod_bf16(x, x, x, padding_mask)).astype(jnp.float32)
    assert jnp.allclose(out_bf, ref, atol=5e-2, rtol=5e-2), "bf16 mismatch vs reference"

    print("KERNEL_OK")
</pallas_src>

<mosaic_0001>
module attributes {stable_mosaic.version = 11 : i64} {
  func.func @_qkv_wres_kernel(%arg0: i32, %arg1: memref<16x32xf32, #tpu.memory_space<vmem>>, %arg2: memref<32x32xf32, #tpu.memory_space<vmem>>, %arg3: memref<32x32xf32, #tpu.memory_space<vmem>>, %arg4: memref<32x32xf32, #tpu.memory_space<vmem>>, %arg5: memref<1x32xf32, #tpu.memory_space<vmem>>, %arg6: memref<1x32xf32, #tpu.memory_space<vmem>>, %arg7: memref<1x32xf32, #tpu.memory_space<vmem>>, %arg8: memref<16x32xf32, #tpu.memory_space<vmem>>, %arg9: memref<16x32xf32, #tpu.memory_space<vmem>>, %arg10: memref<16x32xf32, #tpu.memory_space<vmem>>) attributes {dimension_semantics = [#tpu.dimension_semantics<parallel>], iteration_bounds = array<i64: 1>, scalar_prefetch = 0 : i64, scratch_operands = 0 : i64, tpu.core_type = #tpu.core_type<tc>, window_params = [{transform_indices = @transform_0, window_bounds = array<i64: 16, 32>}, {pipeline_mode = #tpu.pipeline_mode<synchronous>, transform_indices = @transform_1, window_bounds = array<i64: 32, 32>}, {pipeline_mode = #tpu.pipeline_mode<synchronous>, transform_indices = @transform_2, window_bounds = array<i64: 32, 32>}, {pipeline_mode = #tpu.pipeline_mode<synchronous>, transform_indices = @transform_3, window_bounds = array<i64: 32, 32>}, {pipeline_mode = #tpu.pipeline_mode<synchronous>, transform_indices = @transform_4, window_bounds = array<i64: 1, 32>}, {pipeline_mode = #tpu.pipeline_mode<synchronous>, transform_indices = @transform_5, window_bounds = array<i64: 1, 32>}, {pipeline_mode = #tpu.pipeline_mode<synchronous>, transform_indices = @transform_6, window_bounds = array<i64: 1, 32>}, {transform_indices = @transform_7, window_bounds = array<i64: 16, 32>}, {transform_indices = @transform_8, window_bounds = array<i64: 16, 32>}, {transform_indices = @transform_9, window_bounds = array<i64: 16, 32>}]} {
    %c0 = arith.constant 0 : index
    %c0_0 = arith.constant 0 : index
    %0 = vector.load %arg1[%c0, %c0_0] : memref<16x32xf32, #tpu.memory_space<vmem>>, vector<16x32xf32>
    %c0_1 = arith.constant 0 : index
    %c0_2 = arith.constant 0 : index
    %1 = vector.load %arg2[%c0_1, %c0_2] : memref<32x32xf32, #tpu.memory_space<vmem>>, vector<32x32xf32>
    %cst = arith.constant dense<0.000000e+00> : vector<16x32xf32>
    %2 = tpu.matmul %0, %1, %cst {dimension_numbers = #tpu.dot_dimension_numbers<[1], [0], [0], [1], [0, 0, 1, 1], [], []>} : vector<16x32xf32>, vector<32x32xf32>, vector<16x32xf32> -> vector<16x32xf32>
    %c0_3 = arith.constant 0 : index
    %c0_4 = arith.constant 0 : index
    %3 = vector.load %arg5[%c0_3, %c0_4] : memref<1x32xf32, #tpu.memory_space<vmem>>, vector<1x32xf32>
    %4 = vector.broadcast %3 : vector<1x32xf32> to vector<16x32xf32>
    %5 = arith.addf %2, %4 : vector<16x32xf32>
    %c0_5 = arith.constant 0 : index
    %c0_6 = arith.constant 0 : index
    %6 = vector.load %arg8[%c0_5, %c0_6] : memref<16x32xf32, #tpu.memory_space<vmem>>, vector<16x32xf32>
    tpu.vector_store %arg8[%c0_5, %c0_6], %5 {strides = array<i32>} : memref<16x32xf32, #tpu.memory_space<vmem>>, vector<16x32xf32>,
    %c0_7 = arith.constant 0 : index
    %c0_8 = arith.constant 0 : index
    %7 = vector.load %arg3[%c0_7, %c0_8] : memref<32x32xf32, #tpu.memory_space<vmem>>, vector<32x32xf32>
    %cst_9 = arith.constant dense<0.000000e+00> : vector<16x32xf32>
    %8 = tpu.matmul %0, %7, %cst_9 {dimension_numbers = #tpu.dot_dimension_numbers<[1], [0], [0], [1], [0, 0, 1, 1], [], []>} : vector<16x32xf32>, vector<32x32xf32>, vector<16x32xf32> -> vector<16x32xf32>
    %c0_10 = arith.constant 0 : index
    %c0_11 = arith.constant 0 : index
    %9 = vector.load %arg6[%c0_10, %c0_11] : memref<1x32xf32, #tpu.memory_space<vmem>>, vector<1x32xf32>
    %10 = vector.broadcast %9 : vector<1x32xf32> to vector<16x32xf32>
    %11 = arith.addf %8, %10 : vector<16x32xf32>
    %c0_12 = arith.constant 0 : index
    %c0_13 = arith.constant 0 : index
    %12 = vector.load %arg9[%c0_12, %c0_13] : memref<16x32xf32, #tpu.memory_space<vmem>>, vector<16x32xf32>
    tpu.vector_store %arg9[%c0_12, %c0_13], %11 {strides = array<i32>} : memref<16x32xf32, #tpu.memory_space<vmem>>, vector<16x32xf32>,
    %c0_14 = arith.constant 0 : index
    %c0_15 = arith.constant 0 : index
    %13 = vector.load %arg4[%c0_14, %c0_15] : memref<32x32xf32, #tpu.memory_space<vmem>>, vector<32x32xf32>
    %cst_16 = arith.constant dense<0.000000e+00> : vector<16x32xf32>
    %14 = tpu.matmul %0, %13, %cst_16 {dimension_numbers = #tpu.dot_dimension_numbers<[1], [0], [0], [1], [0, 0, 1, 1], [], []>} : vector<16x32xf32>, vector<32x32xf32>, vector<16x32xf32> -> vector<16x32xf32>
    %c0_17 = arith.constant 0 : index
    %c0_18 = arith.constant 0 : index
    %15 = vector.load %arg7[%c0_17, %c0_18] : memref<1x32xf32, #tpu.memory_space<vmem>>, vector<1x32xf32>
    %16 = vector.broadcast %15 : vector<1x32xf32> to vector<16x32xf32>
    %17 = arith.addf %14, %16 : vector<16x32xf32>
    %c0_19 = arith.constant 0 : index
    %c0_20 = arith.constant 0 : index
    %18 = vector.load %arg10[%c0_19, %c0_20] : memref<16x32xf32, #tpu.memory_space<vmem>>, vector<16x32xf32>
    tpu.vector_store %arg10[%c0_19, %c0_20], %17 {strides = array<i32>} : memref<16x32xf32, #tpu.memory_space<vmem>>, vector<16x32xf32>,
    return
  }
  func.func @transform_0(%arg0: i32) -> (i32, i32) {
    %c0_i32 = arith.constant 0 : i32
    %c0_i32_0 = arith.constant 0 : i32
    return %arg0, %c0_i32 : i32, i32
  }
  func.func @transform_1(%arg0: i32) -> (i32, i32) {
    %c0_i32 = arith.constant 0 : i32
    %c0_i32_0 = arith.constant 0 : i32
    %c0_i32_1 = arith.constant 0 : i32
    return %c0_i32, %c0_i32_0 : i32, i32
  }
  func.func @transform_2(%arg0: i32) -> (i32, i32) {
    %c0_i32 = arith.constant 0 : i32
    %c0_i32_0 = arith.constant 0 : i32
    %c0_i32_1 = arith.constant 0 : i32
    return %c0_i32, %c0_i32_0 : i32, i32
  }
  func.func @transform_3(%arg0: i32) -> (i32, i32) {
    %c0_i32 = arith.constant 0 : i32
    %c0_i32_0 = arith.constant 0 : i32
    %c0_i32_1 = arith.constant 0 : i32
    return %c0_i32, %c0_i32_0 : i32, i32
  }
  func.func @transform_4(%arg0: i32) -> (i32, i32) {
    %c0_i32 = arith.constant 0 : i32
    %c0_i32_0 = arith.constant 0 : i32
    %c0_i32_1 = arith.constant 0 : i32
    return %c0_i32, %c0_i32_0 : i32, i32
  }
  func.func @transform_5(%arg0: i32) -> (i32, i32) {
    %c0_i32 = arith.constant 0 : i32
    %c0_i32_0 = arith.constant 0 : i32
    %c0_i32_1 = arith.constant 0 : i32
    return %c0_i32, %c0_i32_0 : i32, i32
  }
  func.func @transform_6(%arg0: i32) -> (i32, i32) {
    %c0_i32 = arith.constant 0 : i32
    %c0_i32_0 = arith.constant 0 : i32
    %c0_i32_1 = arith.constant 0 : i32
    return %c0_i32, %c0_i32_0 : i32, i32
  }
  func.func @transform_7(%arg0: i32) -> (i32, i32) {
    %c0_i32 = arith.constant 0 : i32
    %c0_i32_0 = arith.constant 0 : i32
    return %arg0, %c0_i32 : i32, i32
  }
  func.func @transform_8(%arg0: i32) -> (i32, i32) {
    %c0_i32 = arith.constant 0 : i32
    %c0_i32_0 = arith.constant 0 : i32
    return %arg0, %c0_i32 : i32, i32
  }
  func.func @transform_9(%arg0: i32) -> (i32, i32) {
    %c0_i32 = arith.constant 0 : i32
    %c0_i32_0 = arith.constant 0 : i32
    return %arg0, %c0_i32 : i32, i32
  }
}

</mosaic_0001>

<bundles_post_ra>
// kernel: tpu_custom_call.1
= control target key start
LH: loop header
LB: loop body
LE: loop exit
PB: predicated region body
PF: predicated region fallthrough
CT: control target
= control target key end

     0   :  { %15 = vsyncpa [#allocation3], 0  ;;  %s750_s0 = inlined_call_operand.hbm [shape: f32[16,32], index: 0, kind: input, shape index: {}]   ;;  %s751_s1 = inlined_call_operand.hbm [shape: f32[32,32], index: 1, kind: input, shape index: {}]   ;;  %s752_s2 = inlined_call_operand.hbm [shape: f32[32,32], index: 2, kind: input, shape index: {}]   ;;  %s753_s3 = inlined_call_operand.hbm [shape: f32[32,32], index: 3, kind: input, shape index: {}]   ;;  %s754_s4 = inlined_call_operand.vmem [shape: f32[1,32], index: 4, kind: input, shape index: {}]   ;;  %s755_s5 = inlined_call_operand.vmem [shape: f32[1,32], index: 5, kind: input, shape index: {}]   ;;  %s756_s6 = inlined_call_operand.vmem [shape: f32[1,32], index: 6, kind: input, shape index: {}]   ;;  %s757_s7 = inlined_call_operand.hbm [shape: f32[16,32], index: 7, kind: output, shape index: {0}]   ;;  %s758_s8 = inlined_call_operand.hbm [shape: f32[16,32], index: 8, kind: output, shape index: {1}]   ;;  %s759_s9 = inlined_call_operand.hbm [shape: f32[16,32], index: 9, kind: output, shape index: {2}]  }
   0x1   :  { %16 = vsyncpa [#allocation6], 0 }
   0x2   :  { %17 = vsyncpa [#allocation9], 0 }
   0x3   :  { %18 = vsyncpa [#allocation4], 0 }
   0x4   :  { %19 = vsyncpa [#allocation12], 0  ;;  %s628_s30 = smov [#allocation5]   ;;  %s629_s11 = smov [#allocation2]  }
   0x5   :  { %s37_s10 = sshll.u32 %s628_s30, 4  ;;  %s25_s12 = sshll.u32 %s629_s11, 4  ;;  %s38_s10 = int_to_ptr.vmem [resolvable:$true] %s37_s10  ;;  %s26_s12 = int_to_ptr.vmem [resolvable:$true] %s25_s12 }
   0x6   :  { %s486_s13 = scalar_lea.vmem %s38_s10, 512  ;;  %p491_p1 = scmp.lt.s32.totalorder %s38_s10, %s38_s10 }
   0x7   :  { %p487_p0 = scmp.ne.s32.totalorder %s38_s10, %s486_s13  ;;  %p492_p2 = scmp.lt.s32.totalorder %s486_s13, %s486_s13 }
   0x9   :  { %p493_p3 = por %p492_p2, %p491_p1 }
   0xb   :  { %p494_p4 = pnand %p493_p3, %p487_p0 }
   0xd   :  { %497 = shalt.err (!%p494_p4)
}
   0xe   :  { %s630_s14 = smov 128   ;;  %s631_s15 = smov 8  }
   0xf   :  { %43 = dma.hbm_to_vmem [thread:$0]  %s751_s1, 512, %s38_s10, [#allocation6], %s630_s14, %s630_s14, %s631_s15  }
  0x10   :  { %s506_s18 = scalar_lea.vmem %s26_s12, 256  ;;  %p511_p6 = scmp.lt.s32.totalorder %s26_s12, %s26_s12 }
  0x11   :  { %p507_p5 = scmp.ne.s32.totalorder %s26_s12, %s506_s18  ;;  %p512_p7 = scmp.lt.s32.totalorder %s506_s18, %s506_s18 }
  0x13   :  { %p513_p8 = por %p512_p7, %p511_p6 }
  0x15   :  { %p514_p9 = pnand %p513_p8, %p507_p5 }
  0x17   :  { %517 = shalt.err (!%p514_p9)
}
  0x18   :  { %31 = dma.hbm_to_vmem [thread:$0]  %s750_s0, 256, %s26_s12, [#allocation3], %s630_s14, %s630_s14, %s631_s15  }
  0x19   :  { %s632_s21 = smov [#allocation7]   ;;  %s633_s23 = smov [#allocation8]  }
  0x1a   :  { %s49_s22 = sshll.u32 %s632_s21, 4  ;;  %s61_s24 = sshll.u32 %s633_s23, 4  ;;  %s50_s22 = int_to_ptr.vmem [resolvable:$true] %s49_s22  ;;  %s62_s24 = int_to_ptr.vmem [resolvable:$true] %s61_s24 }
  0x1b   :  { %s526_s1 = scalar_lea.vmem %s50_s22, 512  ;;  %p531_p11 = scmp.lt.s32.totalorder %s50_s22, %s50_s22 }
  0x1c   :  { %p527_p10 = scmp.ne.s32.totalorder %s50_s22, %s526_s1  ;;  %p532_p12 = scmp.lt.s32.totalorder %s526_s1, %s526_s1 }
  0x1e   :  { %p533_p13 = por %p532_p12, %p531_p11 }
  0x20   :  { %p534_p0 = pnand %p533_p13, %p527_p10 }
  0x22   :  { %537 = shalt.err (!%p534_p0)
}
  0x23   :  { %55 = dma.hbm_to_vmem [thread:$0]  %s752_s2, 512, %s50_s22, [#allocation6], %s630_s14, %s630_s14, %s631_s15  }
  0x24   :  { %s546_s0 = scalar_lea.vmem %s62_s24, 512  ;;  %p551_p2 = scmp.lt.s32.totalorder %s62_s24, %s62_s24 }
  0x25   :  { %p547_p1 = scmp.ne.s32.totalorder %s62_s24, %s546_s0  ;;  %p552_p3 = scmp.lt.s32.totalorder %s546_s0, %s546_s0 }
  0x27   :  { %p553_p4 = por %p552_p3, %p551_p2 }
  0x29   :  { %p554_p5 = pnand %p553_p4, %p547_p1 }
  0x2b   :  { %557 = shalt.err (!%p554_p5)
}
  0x2c   :  { %67 = dma.hbm_to_vmem [thread:$0]  %s753_s3, 512, %s62_s24, [#allocation9], %s630_s14, %s630_s14, %s631_s15  }
  0x2d   :  { %618 = dma.done.wait [#allocation3], 256  }
  0x2e   :  { %619 = vsyncadd [#allocation3], 4294967040 }
  0x2f   :  { %620 = dma.done.wait [#allocation6], 1024  }
  0x30   :  { %621 = vsyncadd [#allocation6], 4294966272 }
  0x31   :  { %622 = dma.done.wait [#allocation9], 512  }
  0x32   :  { %623 = vsyncadd [#allocation9], 4294966784  ;;  %v91_v0 = vld [vmem:[#allocation5 + $0x18] sm:$0xff]  ;;  %v90_v1 = vld [vmem:[#allocation5 + $0x10] sm:$0xff]  ;;  %vm99_vm0 = vcmask 261120   ;;  %s634_s29 = smov [#allocation10]  }
  0x33   :  { %436 = vmatprep.subr.mxu0 %v91_v0  ;;  %v186_v2 = vld [vmem:[#allocation7 + $0x18] sm:$0xff]  ;;  %v86_v3 = vld [vmem:[#allocation2] sm:$0xff]  ;;  %v89_v4 = vld [vmem:[#allocation5 + $0x8] sm:$0xff]  ;;  %s364_s30 = sshll.u32 %s634_s29, 4  ;;  %s635_s12 = smov [#allocation11]   ;;  %s365_s30 = int_to_ptr.vmem [resolvable:$true] %s364_s30 }
  0x34   :  { %437 = vmatpush3.msra.mxu0 %v91_v0  ;;  %447 = vmatprep.subr.mxu1 %v186_v2  ;;  %v185_v5 = vld [vmem:[#allocation7 + $0x10] sm:$0xff]  ;;  %v88_v6 = vld [vmem:[#allocation5] sm:$0xff]  ;;  %v184_v7 = vld [vmem:[#allocation7 + $0x8] sm:$0xff]  ;;  %s376_s13 = sshll.u32 %s635_s12, 4  ;;  %s558_s17 = scalar_lea.vmem %s365_s30, 256  ;;  %s377_s13 = int_to_ptr.vmem [resolvable:$true] %s376_s13 }
  0x35   :  { %438 = vmatprep.subr.mxu0 %v90_v1  ;;  %448 = vmatpush3.msra.mxu1 %v186_v2  ;;  %v87_v8 = vld [vmem:[#allocation2 + $0x8] sm:$0xff]  ;;  %v183_v10 = vld [vmem:[#allocation7] sm:$0xff]  ;;  %v273_v11 = vld [vmem:[#allocation8 + $0x10] sm:$0xff]  ;;  %p559_p6 = scmp.ne.s32.totalorder %s365_s30, %s558_s17  ;;  %p563_p7 = scmp.lt.s32.totalorder %s365_s30, %s365_s30 }
  0x36   :  { %439 = vmatpush3.msra.mxu0 %v90_v1  ;;  %444 = vmatprep.mubr.msk.f32.mxu0 %vm99_vm0, %v86_v3  ;;  %v274_v9 = vld [vmem:[#allocation8 + $0x18] sm:$0xff]  ;;  %v272_v12 = vld [vmem:[#allocation8 + $0x8] sm:$0xff]  ;;  %v271_v13 = vld [vmem:[#allocation8] sm:$0xff]  ;;  %p564_p8 = scmp.lt.s32.totalorder %s558_s17, %s558_s17 }
  0x37   :  { %440 = vmatprep.subr.mxu0 %v89_v4  ;;  %449 = vmatprep.subr.mxu1 %v185_v5  ;;  %v409_v14 = vld [vmem:[%s754_s4] ss:$0 sm:$0xff] }
  0x38   :  { %441 = vmatpush3.msra.mxu0 %v89_v4  ;;  %450 = vmatpush3.msra.mxu1 %v185_v5  ;;  %v412_v18 = vld [vmem:[%s755_s5] ss:$0 sm:$0xff]  ;;  %p565_p9 = por %p564_p8, %p563_p7 }
  0x39   :  { %442 = vmatprep.subr.mxu0 %v88_v6  ;;  %451 = vmatprep.subr.mxu1 %v184_v7  ;;  %v415_v22 = vld [vmem:[%s756_s6] ss:$0 sm:$0xff] }
  0x3a   :  { %443 = vmatpush3.msra.mxu0 %v88_v6  ;;  %452 = vmatpush3.msra.mxu1 %v184_v7  ;;  %p566_p10 = pnand %p565_p9, %p559_p6 }
  0x3b   :  { %445 = vmatmul.mubr.msk.f32.vlgmr.msra.gmra.mxu0 %vm99_vm0, %v87_v8  ;;  %458 = vmatprep.subr.mxu0 %v274_v9 }
  0x3c   :  { %459 = vmatpush3.msra.mxu0 %v274_v9  ;;  %453 = vmatprep.subr.mxu1 %v183_v10 }
  0x3d   :  { %460 = vmatprep.subr.mxu0 %v273_v11  ;;  %454 = vmatpush3.msra.mxu1 %v183_v10 }
  0x3e   :  { %461 = vmatpush3.msra.mxu0 %v273_v11  ;;  %455 = vmatprep.mubr.msk.f32.mxu1 %vm99_vm0, %v86_v3 }
  0x3f   :  { %462 = vmatprep.subr.mxu0 %v272_v12  ;;  %456 = vmatmul.mubr.msk.f32.vlgmr.msra.gmra.mxu1 %vm99_vm0, %v87_v8 }
  0x40   :  { %463 = vmatpush3.msra.mxu0 %v272_v12  ;;  %466 = vmatprep.mubr.msk.f32.mxu0 %vm99_vm0, %v86_v3 }
  0x41   :  { %464 = vmatprep.subr.mxu0 %v271_v13 }
  0x42   :  { %465 = vmatpush3.msra.mxu0 %v271_v13 }
  0x43   :  { %467 = vmatmul.mubr.msk.f32.vlgmr.msra.gmra.mxu0 %vm99_vm0, %v87_v8 }
  0xfb   :  { %v446_v15 = vpop.f32.mrf.mxu0 }
  0xfc   :  { %v178_v16 = vadd.f32 %v446_v15, %v409_v14 }
  0xfd   :  { %v172_v17 = vpop.f32.mrf.mxu0 }
  0xfe   :  { %182 = vst.msk [vmem:[#allocation10 + $0x8] sm:$0xff] %vm99_vm0, %v178_v16  ;;  %v173_v19 = vadd.f32 %v409_v14, %v172_v17 }
  0xff   :  { %v457_v20 = vpop.f32.mrf.mxu1 }
 0x100   :  { %181 = vst.msk [vmem:[#allocation10] sm:$0xff] %vm99_vm0, %v173_v19  ;;  %v266_v21 = vadd.f32 %v457_v20, %v412_v18 }
 0x101   :  { %v260_v23 = vpop.f32.mrf.mxu1 }
 0x102   :  { %569 = shalt.err (!%p566_p10)
}
 0x103   :  { %370 = dma.vmem_to_hbm [thread:$0]  %s365_s30, 256, %s757_s7, [#allocation4], %s630_s14, %s630_s14, %s631_s15   ;;  %270 = vst.msk [vmem:[#allocation11 + $0x8] sm:$0xff] %vm99_vm0, %v266_v21  ;;  %v261_v24 = vadd.f32 %v412_v18, %v260_v23  ;;  %v468_v25 = vpop.f32.mrf.mxu0 }
 0x104   :  { %s636_s6 = smov [#allocation13]   ;;  %v354_v26 = vadd.f32 %v468_v25, %v415_v22  ;;  %s578_s20 = scalar_lea.vmem %s377_s13, 256 }
 0x105   :  { %s388_s19 = sshll.u32 %s636_s6, 4  ;;  %269 = vst.msk [vmem:[#allocation11] sm:$0xff] %vm99_vm0, %v261_v24  ;;  %v348_v27 = vpop.f32.mrf.mxu0  ;;  %p579_p11 = scmp.ne.s32.totalorder %s377_s13, %s578_s20  ;;  %s389_s19 = int_to_ptr.vmem [resolvable:$true] %s388_s19 }
 0x106   :  { %p583_p12 = scmp.lt.s32.totalorder %s377_s13, %s377_s13  ;;  %p584_p13 = scmp.lt.s32.totalorder %s578_s20, %s578_s20 }
 0x108   :  { %p585_p0 = por %p584_p13, %p583_p12 }
 0x10a   :  { %p586_p1 = pnand %p585_p0, %p579_p11 }
 0x10c   :  { %589 = shalt.err (!%p586_p1)
}
 0x10d   :  { %382 = dma.vmem_to_hbm [thread:$0]  %s377_s13, 256, %s758_s8, [#allocation12], %s630_s14, %s630_s14, %s631_s15   ;;  %358 = vst.msk [vmem:[#allocation13 + $0x8] sm:$0xff] %vm99_vm0, %v354_v26  ;;  %v349_v28 = vadd.f32 %v415_v22, %v348_v27 }
 0x10e   :  { %s598_s22 = scalar_lea.vmem %s389_s19, 256  ;;  %p603_p3 = scmp.lt.s32.totalorder %s389_s19, %s389_s19 }
 0x10f   :  { %357 = vst.msk [vmem:[#allocation13] sm:$0xff] %vm99_vm0, %v349_v28  ;;  %p599_p2 = scmp.ne.s32.totalorder %s389_s19, %s598_s22  ;;  %p604_p4 = scmp.lt.s32.totalorder %s598_s22, %s598_s22 }
 0x111   :  { %p605_p5 = por %p604_p4, %p603_p3 }
 0x113   :  { %p606_p6 = pnand %p605_p5, %p599_p2 }
 0x115   :  { %609 = shalt.err (!%p606_p6)
}
 0x116   :  { %394 = dma.vmem_to_hbm [thread:$0]  %s389_s19, 256, %s759_s9, [#allocation12], %s630_s14, %s630_s14, %s631_s15  }
 0x117   :  { %624 = dma.done.wait [#allocation4], 256  }
 0x118   :  { %625 = vsyncadd [#allocation4], 4294967040 }
 0x119   :  { %626 = dma.done.wait [#allocation12], 512  }
 0x11a   :  { %627 = vsyncadd [#allocation12], 4294966784 }
 0x11b   :  { %404 = vsyncpa [#allocation3], 1 }
 0x11c   :  { %405 = vsyncpa [#allocation6], 1 }
 0x11d   :  { %406 = vsyncpa [#allocation9], 1 }
 0x11e   :  { %407 = vsyncpa [#allocation4], 1 }
 0x11f   :  { %408 = vsyncpa [#allocation12], 1 }

</bundles_post_ra>
